<compile_context>
chip_gen: v5e
topology: v5e:2x2
jax: 0.10.0
libtpu: 0.0.40
codegen_flags: <defaults>
</compile_context>

<pallas_src>
import functools

import jax
import jax.numpy as jnp
from jax.experimental import pallas as pl
from jax.experimental.pallas import tpu as pltpu

# ---- synthetic config (stands in for the external `C` constants) -----------
STATE_DIM = 8
ACTOR_NET_STRUCTURE = [32, 32]
ACTION_DIM = 4


# ---- Pallas kernel: whole network fused in one call -------------------------
def _actor_fused_kernel(*refs, num_layers):
    # refs = (x_ref, w0, b0, w1, b1, ..., o_ref); all natural shapes, VMEM-resident.
    x_ref = refs[0]
    o_ref = refs[-1]
    h = x_ref[...]
    for i in range(num_layers):
        w_ref = refs[1 + 2 * i]
        b_ref = refs[2 + 2 * i]
        h = jnp.dot(h, w_ref[...], preferred_element_type=jnp.float32) + b_ref[...]
        if i < num_layers - 1:
            h = jnp.maximum(h, 0.0)     # ReLU between layers (VPU)
        else:
            h = jnp.tanh(h)             # Tanh at the end (EUP)
    o_ref[...] = h.astype(o_ref.dtype)


# ---- parameter construction (deterministic, mirrors nn.Linear + kaiming) ----
def make_actor_params(key):
    net_structure = [STATE_DIM] + ACTOR_NET_STRUCTURE + [ACTION_DIM]
    # Layer dims exactly as create_net builds them:
    #   Linear(STATE_DIM, net_structure[0]) then Linear(ns[i], ns[i+1]) for each i.
    dims = [(STATE_DIM, net_structure[0])]
    for i in range(len(net_structure) - 1):
        dims.append((net_structure[i], net_structure[i + 1]))

    params = []
    for (fan_in, fan_out) in dims:
        key, kw, kb = jax.random.split(key, 3)
        # kaiming_normal_: std = sqrt(2 / fan_in)  (default a=0, fan_in, leaky_relu)
        w = jax.random.normal(kw, (fan_in, fan_out), jnp.float32) * jnp.sqrt(
            2.0 / fan_in
        )
        # PyTorch Linear default bias: U(-1/sqrt(fan_in), 1/sqrt(fan_in)).
        # Stored as (1, fan_out) so the in-kernel add broadcasts over batch.
        bound = 1.0 / jnp.sqrt(fan_in)
        b = jax.random.uniform(
            kb, (1, fan_out), jnp.float32, minval=-bound, maxval=bound
        )
        params.append((w, b))
    return params


# ---- forward pass ------------------------------------------------------------
@jax.jit
def actor_forward(params, x):
    """Fused Actor forward: one pallas_call, natural shapes, all VMEM-resident."""
    B = x.shape[0]
    n_layers = len(params)
    out_dim = params[-1][0].shape[1]

    flat_params = []
    for w, b in params:
        flat_params.extend((w, b))

    vmem_spec = pl.BlockSpec(memory_space=pltpu.MemorySpace.VMEM)
    kernel = functools.partial(_actor_fused_kernel, num_layers=n_layers)

    return pl.pallas_call(
        kernel,
        out_shape=jax.ShapeDtypeStruct((B, out_dim), jnp.float32),
        in_specs=[vmem_spec] * (1 + 2 * n_layers),
        out_specs=vmem_spec,
    )(x.astype(jnp.float32), *flat_params)


def actor_forward_ref(params, x):
    h = x
    n = len(params)
    for idx, (w, b) in enumerate(params):
        h = h @ w + b
        if idx < n - 1:
            h = jnp.maximum(h, 0.0)
        else:
            h = jnp.tanh(h)
    return h


if __name__ == "__main__":
    key = jax.random.PRNGKey(0)
    kp, kx = jax.random.split(key)
    params = make_actor_params(kp)

    batch = 2
    x = jax.random.normal(kx, (batch, STATE_DIM), jnp.float32)

    out = actor_forward(params, x)
    out = jax.block_until_ready(out)

    ref = actor_forward_ref(params, x)
    assert out.shape == (batch, ACTION_DIM)
    assert jnp.allclose(out, ref, atol=1e-5, rtol=1e-5)

    print("KERNEL_OK")
</pallas_src>

<mosaic_0001>
module attributes {stable_mosaic.version = 11 : i64} {
  func.func @_actor_fused_kernel(%arg0: memref<2x8xf32, #tpu.memory_space<vmem>>, %arg1: memref<8x8xf32, #tpu.memory_space<vmem>>, %arg2: memref<1x8xf32, #tpu.memory_space<vmem>>, %arg3: memref<8x32xf32, #tpu.memory_space<vmem>>, %arg4: memref<1x32xf32, #tpu.memory_space<vmem>>, %arg5: memref<32x32xf32, #tpu.memory_space<vmem>>, %arg6: memref<1x32xf32, #tpu.memory_space<vmem>>, %arg7: memref<32x4xf32, #tpu.memory_space<vmem>>, %arg8: memref<1x4xf32, #tpu.memory_space<vmem>>, %arg9: memref<2x4xf32, #tpu.memory_space<vmem>>) attributes {dimension_semantics = [], scalar_prefetch = 0 : i64, scratch_operands = 0 : i64, tpu.core_type = #tpu.core_type<tc>} {
    %c0 = arith.constant 0 : index
    %c0_0 = arith.constant 0 : index
    %0 = vector.load %arg0[%c0, %c0_0] : memref<2x8xf32, #tpu.memory_space<vmem>>, vector<2x8xf32>
    %c0_1 = arith.constant 0 : index
    %c0_2 = arith.constant 0 : index
    %1 = vector.load %arg1[%c0_1, %c0_2] : memref<8x8xf32, #tpu.memory_space<vmem>>, vector<8x8xf32>
    %cst = arith.constant dense<0.000000e+00> : vector<2x8xf32>
    %2 = tpu.matmul %0, %1, %cst {dimension_numbers = #tpu.dot_dimension_numbers<[1], [0], [0], [1], [0, 0, 1, 1], [], []>} : vector<2x8xf32>, vector<8x8xf32>, vector<2x8xf32> -> vector<2x8xf32>
    %c0_3 = arith.constant 0 : index
    %c0_4 = arith.constant 0 : index
    %3 = vector.load %arg2[%c0_3, %c0_4] : memref<1x8xf32, #tpu.memory_space<vmem>>, vector<1x8xf32>
    %4 = vector.broadcast %3 : vector<1x8xf32> to vector<2x8xf32>
    %5 = arith.addf %2, %4 : vector<2x8xf32>
    %cst_5 = arith.constant 0.000000e+00 : f32
    %6 = vector.broadcast %cst_5 : f32 to vector<2x8xf32>
    %7 = arith.maximumf %5, %6 : vector<2x8xf32>
    %c0_6 = arith.constant 0 : index
    %c0_7 = arith.constant 0 : index
    %8 = vector.load %arg3[%c0_6, %c0_7] : memref<8x32xf32, #tpu.memory_space<vmem>>, vector<8x32xf32>
    %cst_8 = arith.constant dense<0.000000e+00> : vector<2x32xf32>
    %9 = tpu.matmul %7, %8, %cst_8 {dimension_numbers = #tpu.dot_dimension_numbers<[1], [0], [0], [1], [0, 0, 1, 1], [], []>} : vector<2x8xf32>, vector<8x32xf32>, vector<2x32xf32> -> vector<2x32xf32>
    %c0_9 = arith.constant 0 : index
    %c0_10 = arith.constant 0 : index
    %10 = vector.load %arg4[%c0_9, %c0_10] : memref<1x32xf32, #tpu.memory_space<vmem>>, vector<1x32xf32>
    %11 = vector.broadcast %10 : vector<1x32xf32> to vector<2x32xf32>
    %12 = arith.addf %9, %11 : vector<2x32xf32>
    %cst_11 = arith.constant 0.000000e+00 : f32
    %13 = vector.broadcast %cst_11 : f32 to vector<2x32xf32>
    %14 = arith.maximumf %12, %13 : vector<2x32xf32>
    %c0_12 = arith.constant 0 : index
    %c0_13 = arith.constant 0 : index
    %15 = vector.load %arg5[%c0_12, %c0_13] : memref<32x32xf32, #tpu.memory_space<vmem>>, vector<32x32xf32>
    %cst_14 = arith.constant dense<0.000000e+00> : vector<2x32xf32>
    %16 = tpu.matmul %14, %15, %cst_14 {dimension_numbers = #tpu.dot_dimension_numbers<[1], [0], [0], [1], [0, 0, 1, 1], [], []>} : vector<2x32xf32>, vector<32x32xf32>, vector<2x32xf32> -> vector<2x32xf32>
    %c0_15 = arith.constant 0 : index
    %c0_16 = arith.constant 0 : index
    %17 = vector.load %arg6[%c0_15, %c0_16] : memref<1x32xf32, #tpu.memory_space<vmem>>, vector<1x32xf32>
    %18 = vector.broadcast %17 : vector<1x32xf32> to vector<2x32xf32>
    %19 = arith.addf %16, %18 : vector<2x32xf32>
    %cst_17 = arith.constant 0.000000e+00 : f32
    %20 = vector.broadcast %cst_17 : f32 to vector<2x32xf32>
    %21 = arith.maximumf %19, %20 : vector<2x32xf32>
    %c0_18 = arith.constant 0 : index
    %c0_19 = arith.constant 0 : index
    %22 = vector.load %arg7[%c0_18, %c0_19] : memref<32x4xf32, #tpu.memory_space<vmem>>, vector<32x4xf32>
    %cst_20 = arith.constant dense<0.000000e+00> : vector<2x4xf32>
    %23 = tpu.matmul %21, %22, %cst_20 {dimension_numbers = #tpu.dot_dimension_numbers<[1], [0], [0], [1], [0, 0, 1, 1], [], []>} : vector<2x32xf32>, vector<32x4xf32>, vector<2x4xf32> -> vector<2x4xf32>
    %c0_21 = arith.constant 0 : index
    %c0_22 = arith.constant 0 : index
    %24 = vector.load %arg8[%c0_21, %c0_22] : memref<1x4xf32, #tpu.memory_space<vmem>>, vector<1x4xf32>
    %25 = vector.broadcast %24 : vector<1x4xf32> to vector<2x4xf32>
    %26 = arith.addf %23, %25 : vector<2x4xf32>
    %27 = math.tanh %26 : vector<2x4xf32>
    %c0_23 = arith.constant 0 : index
    %c0_24 = arith.constant 0 : index
    %28 = vector.load %arg9[%c0_23, %c0_24] : memref<2x4xf32, #tpu.memory_space<vmem>>, vector<2x4xf32>
    tpu.vector_store %arg9[%c0_23, %c0_24], %27 {strides = array<i32>} : memref<2x4xf32, #tpu.memory_space<vmem>>, vector<2x4xf32>,
    return
  }
}

</mosaic_0001>

<bundles_post_ra>
// kernel: actor_forward.1
= control target key start
LH: loop header
LB: loop body
LE: loop exit
PB: predicated region body
PF: predicated region fallthrough
CT: control target
= control target key end

     0   :  { %14 = vsyncpa [#allocation3], 0  ;;  %s398_s0 = inlined_call_operand.vmem [shape: f32[2,8], index: 0, kind: input, shape index: {}]   ;;  %s399_s1 = inlined_call_operand.hbm [shape: f32[8,8], index: 1, kind: input, shape index: {}]   ;;  %s400_s2 = inlined_call_operand.vmem [shape: f32[1,8], index: 2, kind: input, shape index: {}]   ;;  %s401_s3 = inlined_call_operand.hbm [shape: f32[8,32], index: 3, kind: input, shape index: {}]   ;;  %s402_s4 = inlined_call_operand.vmem [shape: f32[1,32], index: 4, kind: input, shape index: {}]   ;;  %s403_s5 = inlined_call_operand.vmem [shape: f32[32,32], index: 5, kind: input, shape index: {}]   ;;  %s404_s6 = inlined_call_operand.vmem [shape: f32[1,32], index: 6, kind: input, shape index: {}]   ;;  %s405_s7 = inlined_call_operand.vmem [shape: f32[32,4], index: 7, kind: input, shape index: {}]   ;;  %s406_s8 = inlined_call_operand.vmem [shape: f32[1,4], index: 8, kind: input, shape index: {}]   ;;  %s407_s9 = inlined_call_operand.hbm [shape: f32[2,4], index: 9, kind: output, shape index: {}]  }
   0x1   :  { %15 = vsyncpa [#allocation6], 0 }
   0x2   :  { %16 = vsyncpa [#allocation4], 0  ;;  %s24_s11 = sshll.u32 %s399_s1, 4  ;;  %s297_s12 = smov [#allocation2]   ;;  %s25_s11 = int_to_ptr.hbm [resolvable:$true] %s24_s11 }
   0x3   :  { %s26_s13 = sshll.u32 %s297_s12, 4  ;;  %s37_s16 = sshll.u32 %s401_s3, 4  ;;  %s27_s13 = int_to_ptr.vmem [resolvable:$true] %s26_s13  ;;  %s38_s16 = int_to_ptr.hbm [resolvable:$true] %s37_s16 }
   0x4   :  { %29 = dma.hbm_to_vmem [thread:$0]  %s25_s11, 128, %s27_s13, [#allocation3]  }
   0x5   :  { %s298_s17 = smov [#allocation5]  }
   0x6   :  { %s39_s18 = sshll.u32 %s298_s17, 4  ;;  %s40_s18 = int_to_ptr.vmem [resolvable:$true] %s39_s18 }
   0x7   :  { %42 = dma.hbm_to_vmem [thread:$0]  %s38_s16, 128, %s40_s18, [#allocation6]  }
   0x8   :  { %291 = dma.done.wait [#allocation3], 128  }
   0x9   :  { %292 = vsyncadd [#allocation3], 4294967168 }
   0xa   :  { %293 = dma.done.wait [#allocation6], 128  }
   0xb   :  { %294 = vsyncadd [#allocation6], 4294967168  ;;  %vm67_vm0 = vcmask 64512   ;;  %v62_v0 = vld [vmem:[#allocation2] sm:$0xff]  ;;  %v92_v2 = vld [vmem:[#allocation5] sm:$0xff]  ;;  %vm129_vm1 = vcmask 261120  }
   0xc   :  { %v61_v1 = vld [vmem:[%s398_s0] sm:$0x3]  ;;  %86 = vmatpush.msra.mxu0 %v62_v0  ;;  %115 = vmatpush.msra.mxu1 %v92_v2  ;;  %v124_v3 = vld [vmem:[%s403_s5 + $0x18] sm:$0xff]  ;;  %v123_v8 = vld [vmem:[%s403_s5 + $0x10] sm:$0xff]  ;;  %s299_s18 = smov [#allocation7]   ;;  %s195_s3 = sshll.u32 %s407_s9, 4  ;;  %s196_s3 = int_to_ptr.hbm [resolvable:$true] %s195_s3 }
   0xd   :  { %206 = vmatmul.msk.f32.vlgmr.msra.gmra.mxu0 %vm67_vm0, %v61_v1  ;;  %145 = vmatpush.msra.mxu2 %v124_v3  ;;  %v213_v4 = vld [vmem:[%s400_s2] ss:$0 sm:$0xff]  ;;  %v122_v9 = vld [vmem:[%s403_s5 + $0x8] sm:$0xff]  ;;  %v157_v11 = vld [vmem:[%s405_s7 + $0x18] sm:$0xff]  ;;  %s193_s1 = sshll.u32 %s299_s18, 4  ;;  %vm186_vm2 = vcmask 25600   ;;  %s194_s1 = int_to_ptr.vmem [resolvable:$true] %s193_s1 }
   0xe   :  { %v121_v10 = vld [vmem:[%s403_s5] sm:$0xff]  ;;  %177 = vmatpush.msra.mxu3 %v157_v11  ;;  %v156_v16 = vld [vmem:[%s405_s7 + $0x10] sm:$0xff]  ;;  %v155_v17 = vld [vmem:[%s405_s7 + $0x8] sm:$0xff] }
   0xf   :  { %146 = vmatpush.msra.mxu2 %v123_v8  ;;  %v214_v12 = vld [vmem:[%s402_s4] ss:$0 sm:$0xff] }
  0x10   :  { %178 = vmatpush.msra.mxu3 %v156_v16  ;;  %v154_v18 = vld [vmem:[%s405_s7] sm:$0xff] }
  0x11   :  { %147 = vmatpush.msra.mxu2 %v122_v9  ;;  %v215_v19 = vld [vmem:[%s404_s6] ss:$0 sm:$0xff] }
  0x12   :  { %179 = vmatpush.msra.mxu3 %v155_v17  ;;  %v216_v23 = vld [vmem:[%s406_s8] ss:$0 sm:$0xff] }
  0x13   :  { %148 = vmatpush.msra.mxu2 %v121_v10 }
  0x14   :  { %180 = vmatpush.msra.mxu3 %v154_v18 }
  0x8a   :  { %v88_v5 = vpop.f32.mrf.mxu0 }
  0x8b   :  { %v89_v6 = vadd.f32 %v213_v4, %v88_v5 }
  0x8d   :  { %v91_v7 = vmax.f32 %v89_v6, 0.0 }
  0x8f   :  { %207 = vmatmul.msk.f32.vlgmr.msra.gmra.mxu1 %vm67_vm0, %v91_v7 }
 0x10c   :  { %v117_v13 = vpop.f32.mrf.mxu1 }
 0x10d   :  { %v118_v14 = vadd.f32 %v214_v12, %v117_v13 }
 0x10f   :  { %v120_v15 = vmax.f32 %v118_v14, 0.0 }
 0x111   :  { %208 = vmatmul.msk.f32.vlgmr.msra.gmra.mxu2 %vm129_vm1, %v120_v15 }
 0x194   :  { %v150_v20 = vpop.f32.mrf.mxu2 }
 0x195   :  { %v151_v21 = vadd.f32 %v215_v19, %v150_v20 }
 0x197   :  { %v153_v22 = vmax.f32 %v151_v21, 0.0 }
 0x199   :  { %209 = vmatmul.msk.f32.vlgmr.msra.gmra.mxu3 %vm129_vm1, %v153_v22 }
 0x21c   :  { %v182_v24 = vpop.f32.mrf.mxu3 }
 0x21d   :  { %v183_v25 = vadd.f32 %v216_v23, %v182_v24 }
 0x21f   :  { %217 = vtanh.f32 %v183_v25 }
 0x225   :  { %v218_v26 = vpop.eup %217 }
 0x226   :  { %187 = vst.msk [vmem:[#allocation7] sm:$0x3] %vm186_vm2, %v218_v26 }
 0x227   :  { %198 = dma.vmem_to_hbm [thread:$0]  %s194_s1, 32, %s196_s3, [#allocation4]  }
 0x228   :  { %295 = dma.done.wait [#allocation4], 32  }
 0x229   :  { %296 = vsyncadd [#allocation4], 4294967264 }
 0x22a   :  { %203 = vsyncpa [#allocation3], 1 }
 0x22b   :  { %204 = vsyncpa [#allocation6], 1 }
 0x22c   :  { %205 = vsyncpa [#allocation4], 1 }

</bundles_post_ra>
